<compile_context>
chip_gen: v5e
topology: v5e:2x2
jax: 0.10.0
libtpu: 0.0.40
codegen_flags: <defaults>
</compile_context>

<pallas_src>
import math

import jax
import jax.numpy as jnp
import numpy as np
from jax.experimental import pallas as pl
from jax.experimental.pallas import tpu as pltpu


def graph_triple_conv_kernel(
    s_col_ref, o_col_ref,        # (T, 1) int32 edge indices (sublane layout)
    s_row_ref, o_row_ref,        # (1, T) int32 edge indices (lane layout)
    obj_ref, pred_ref,           # (O, Din) f32, (T, Din) f32
    w1so_ref, w1p_ref, b1_ref,   # net1 layer-1 (folded):  (Din, 2H) bf16, (Din, H) bf16, (1, H) f32
    w2_ref, b2_ref,              # net1 layer-2: (H, 2H+Dout) bf16, (1, 2H+Dout) f32
    w3_ref, b3_ref,              # net2 layer-1: (H, H) bf16, (1, H) f32
    w4_ref, b4_ref,              # net2 layer-2: (H, Dout) bf16, (1, Dout) f32
    new_obj_ref, new_p_ref,      # outputs: (O, Dout) f32, (T, Dout) f32
):
    T, Din = pred_ref.shape
    O = obj_ref.shape[0]
    H = b1_ref.shape[1]
    Dout = b4_ref.shape[1]

    # ---- one-hot gather (T, O) and scatter (O, T) matrices, built with no transposes ----
    iota_to = jax.lax.broadcasted_iota(jnp.int32, (T, O), 1)        # object id along lanes
    g_s = (iota_to == s_col_ref[...]).astype(jnp.float32)           # (T, O)  gather for subjects
    g_o = (iota_to == o_col_ref[...]).astype(jnp.float32)           # (T, O)  gather for objects

    iota_ot = jax.lax.broadcasted_iota(jnp.int32, (O, T), 0)        # object id along sublanes
    m_s = (iota_ot == s_row_ref[...]).astype(jnp.float32)           # (O, T)  scatter for subjects
    m_o = (iota_ot == o_row_ref[...]).astype(jnp.float32)           # (O, T)  scatter for objects

    # ---- net1 layer 1 (folded): project objects once, gather projections per edge ----
    obj_bf = obj_ref[...].astype(jnp.bfloat16)
    pred_bf = pred_ref[...].astype(jnp.bfloat16)

    obj_proj = jnp.dot(obj_bf, w1so_ref[...],
                       preferred_element_type=jnp.float32)          # (O, 2H)
    pred_proj = jnp.dot(pred_bf, w1p_ref[...],
                        preferred_element_type=jnp.float32)         # (T, H)

    h1 = (jnp.dot(g_s, obj_proj[:, :H], preferred_element_type=jnp.float32)
          + pred_proj
          + jnp.dot(g_o, obj_proj[:, H:], preferred_element_type=jnp.float32)
          + b1_ref[...])
    h1 = jnp.maximum(h1, 0.0)                                        # ReLU

    # ---- net1 layer 2 + final ReLU, then split (all slices 128-lane aligned) ----
    t2 = jnp.dot(h1.astype(jnp.bfloat16), w2_ref[...],
                 preferred_element_type=jnp.float32) + b2_ref[...]   # (T, 2H+Dout)
    t2 = jnp.maximum(t2, 0.0)

    new_s = t2[:, :H]
    new_p = t2[:, H:H + Dout]
    new_o = t2[:, H + Dout:]

    new_p_ref[...] = new_p

    # ---- scatter_add pooling via matmul, then 'avg' normalization ----
    pooled = (jnp.dot(m_s, new_s, preferred_element_type=jnp.float32)
              + jnp.dot(m_o, new_o, preferred_element_type=jnp.float32))   # (O, H)

    counts = (jnp.sum(m_s, axis=1, keepdims=True)
              + jnp.sum(m_o, axis=1, keepdims=True))                 # (O, 1)
    counts = jnp.maximum(counts, 1.0)
    pooled = pooled * pl.reciprocal(counts, approx=True)

    # ---- net2 ----
    h2 = jnp.dot(pooled.astype(jnp.bfloat16), w3_ref[...],
                 preferred_element_type=jnp.float32) + b3_ref[...]
    h2 = jnp.maximum(h2, 0.0)
    out = jnp.dot(h2.astype(jnp.bfloat16), w4_ref[...],
                  preferred_element_type=jnp.float32) + b4_ref[...]
    new_obj_ref[...] = jnp.maximum(out, 0.0)


def graph_triple_conv(obj_vecs, pred_vecs, edges, kp):
    """obj_vecs (O, Din) f32, pred_vecs (T, Din) f32, edges (T, 2) int -> (new_obj, new_p)."""
    O, Din = obj_vecs.shape
    T = pred_vecs.shape[0]
    H = kp["b1"].shape[1]
    Dout = kp["b4"].shape[1]

    s_idx = edges[:, 0].astype(jnp.int32)
    o_idx = edges[:, 1].astype(jnp.int32)
    args = [
        s_idx.reshape(T, 1), o_idx.reshape(T, 1),
        s_idx.reshape(1, T), o_idx.reshape(1, T),
        obj_vecs, pred_vecs,
        kp["w1so"], kp["w1p"], kp["b1"],
        kp["w2"], kp["b2"],
        kp["w3"], kp["b3"],
        kp["w4"], kp["b4"],
    ]

    vmem = pl.BlockSpec(memory_space=pltpu.MemorySpace.VMEM)
    new_obj, new_p = pl.pallas_call(
        graph_triple_conv_kernel,
        out_shape=(jax.ShapeDtypeStruct((O, Dout), jnp.float32),
                   jax.ShapeDtypeStruct((T, Dout), jnp.float32)),
        in_specs=[vmem] * len(args),
        out_specs=(vmem, vmem),
        compiler_params=pltpu.CompilerParams(vmem_limit_bytes=16 * 1024 * 1024),
    )(*args)
    return new_obj, new_p


# ----------------------------- parameter handling -----------------------------

def init_raw_params(key, Din, H, Dout):
    """Default nn.Linear init (uniform +-1/sqrt(fan_in)), PyTorch weight shape (out, in)."""
    ks = jax.random.split(key, 4)

    def lin(k, fan_in, fan_out):
        bound = 1.0 / math.sqrt(fan_in)
        kw, kb = jax.random.split(k)
        w = jax.random.uniform(kw, (fan_out, fan_in), jnp.float32, -bound, bound)
        b = jax.random.uniform(kb, (fan_out,), jnp.float32, -bound, bound)
        return w, b

    W1, b1 = lin(ks[0], 3 * Din, H)             # net1: Linear(3*Din, H)
    W2, b2 = lin(ks[1], H, 2 * H + Dout)        # net1: Linear(H, 2H+Dout)
    W3, b3 = lin(ks[2], H, H)                   # net2: Linear(H, H)
    W4, b4 = lin(ks[3], H, Dout)                # net2: Linear(H, Dout)
    return {"W1": W1, "b1": b1, "W2": W2, "b2": b2,
            "W3": W3, "b3": b3, "W4": W4, "b4": b4}


def to_kernel_params(raw, Din, H, Dout):
    """Pre-transpose to (in, out), split/fuse net1-layer1, cast weights to bf16 (glue)."""
    W1t = raw["W1"].T                          # (3Din, H)
    w1_s = W1t[:Din]
    w1_p = W1t[Din:2 * Din]
    w1_o = W1t[2 * Din:]
    w1so = jnp.concatenate([w1_s, w1_o], axis=1)   # (Din, 2H) fused obj-side weight
    return {
        "w1so": w1so.astype(jnp.bfloat16),
        "w1p": w1_p.astype(jnp.bfloat16),
        "b1": raw["b1"][None, :].astype(jnp.float32),
        "w2": raw["W2"].T.astype(jnp.bfloat16),
        "b2": raw["b2"][None, :].astype(jnp.float32),
        "w3": raw["W3"].T.astype(jnp.bfloat16),
        "b3": raw["b3"][None, :].astype(jnp.float32),
        "w4": raw["W4"].T.astype(jnp.bfloat16),
        "b4": raw["b4"][None, :].astype(jnp.float32),
    }


# ----------------------------- pure-JAX reference -----------------------------

def reference(obj_vecs, pred_vecs, edges, raw, H, Dout):
    """f32 mirror of GraphTripleConv.forward (pooling='avg')."""
    O = obj_vecs.shape[0]
    s_idx = edges[:, 0]
    o_idx = edges[:, 1]
    cur_s = obj_vecs[s_idx]
    cur_o = obj_vecs[o_idx]
    cur_t = jnp.concatenate([cur_s, pred_vecs, cur_o], axis=1)

    h1 = jax.nn.relu(cur_t @ raw["W1"].T + raw["b1"])
    t2 = jax.nn.relu(h1 @ raw["W2"].T + raw["b2"])
    new_s = t2[:, :H]
    new_p = t2[:, H:H + Dout]
    new_o = t2[:, H + Dout:]

    pooled = jnp.zeros((O, H), jnp.float32).at[s_idx].add(new_s).at[o_idx].add(new_o)
    counts = jnp.zeros((O,), jnp.float32).at[s_idx].add(1.0).at[o_idx].add(1.0)
    counts = jnp.maximum(counts, 1.0)
    pooled = pooled / counts[:, None]

    h2 = jax.nn.relu(pooled @ raw["W3"].T + raw["b3"])
    new_obj = jax.nn.relu(h2 @ raw["W4"].T + raw["b4"])
    return new_obj, new_p


if __name__ == "__main__":
    key = jax.random.PRNGKey(0)
    k_par, k_obj, k_pred, k_edge = jax.random.split(key, 4)

    # Small shapes implied by the module: O objects, T triples, input_dim=hidden_dim=output_dim=128.
    O, T = 16, 24
    Din, H, Dout = 128, 128, 128

    obj_vecs = jax.random.normal(k_obj, (O, Din), jnp.float32)
    pred_vecs = jax.random.normal(k_pred, (T, Din), jnp.float32)
    edges = jax.random.randint(k_edge, (T, 2), 0, O, jnp.int32)

    raw = init_raw_params(k_par, Din, H, Dout)
    kparams = to_kernel_params(raw, Din, H, Dout)

    new_obj, new_p = graph_triple_conv(obj_vecs, pred_vecs, edges, kparams)
    new_obj = jax.block_until_ready(new_obj)
    new_p = jax.block_until_ready(new_p)

    ref_obj, ref_p = reference(obj_vecs, pred_vecs, edges, raw, H, Dout)
    ref_obj = jax.block_until_ready(ref_obj)
    ref_p = jax.block_until_ready(ref_p)

    # bf16 weights + approx reciprocal => modest tolerance vs the f32 reference.
    np.testing.assert_allclose(np.asarray(new_p), np.asarray(ref_p), rtol=5e-2, atol=5e-2)
    np.testing.assert_allclose(np.asarray(new_obj), np.asarray(ref_obj), rtol=5e-2, atol=5e-2)
    assert new_obj.shape == (O, Dout) and new_p.shape == (T, Dout)

    print("KERNEL_OK")
</pallas_src>

<mosaic_0001>
module attributes {stable_mosaic.version = 11 : i64} {
  func.func @graph_triple_conv_kernel(%arg0: memref<24x1xi32, #tpu.memory_space<vmem>>, %arg1: memref<24x1xi32, #tpu.memory_space<vmem>>, %arg2: memref<1x24xi32, #tpu.memory_space<vmem>>, %arg3: memref<1x24xi32, #tpu.memory_space<vmem>>, %arg4: memref<16x128xf32, #tpu.memory_space<vmem>>, %arg5: memref<24x128xf32, #tpu.memory_space<vmem>>, %arg6: memref<128x256xbf16, #tpu.memory_space<vmem>>, %arg7: memref<128x128xbf16, #tpu.memory_space<vmem>>, %arg8: memref<1x128xf32, #tpu.memory_space<vmem>>, %arg9: memref<128x384xbf16, #tpu.memory_space<vmem>>, %arg10: memref<1x384xf32, #tpu.memory_space<vmem>>, %arg11: memref<128x128xbf16, #tpu.memory_space<vmem>>, %arg12: memref<1x128xf32, #tpu.memory_space<vmem>>, %arg13: memref<128x128xbf16, #tpu.memory_space<vmem>>, %arg14: memref<1x128xf32, #tpu.memory_space<vmem>>, %arg15: memref<16x128xf32, #tpu.memory_space<vmem>>, %arg16: memref<24x128xf32, #tpu.memory_space<vmem>>) attributes {dimension_semantics = [], scalar_prefetch = 0 : i64, scratch_operands = 0 : i64, tpu.core_type = #tpu.core_type<tc>} {
    %0 = tpu.iota {dimensions = array<i32: 1>} : vector<24x16xi32>
    %c0 = arith.constant 0 : index
    %c0_0 = arith.constant 0 : index
    %1 = vector.load %arg0[%c0, %c0_0] : memref<24x1xi32, #tpu.memory_space<vmem>>, vector<24x1xi32>
    %2 = vector.broadcast %1 : vector<24x1xi32> to vector<24x16xi32>
    %3 = arith.cmpi eq, %0, %2 : vector<24x16xi32>
    %4 = arith.extui %3 : vector<24x16xi1> to vector<24x16xi32>
    %5 = arith.sitofp %4 : vector<24x16xi32> to vector<24x16xf32>
    %c0_1 = arith.constant 0 : index
    %c0_2 = arith.constant 0 : index
    %6 = vector.load %arg1[%c0_1, %c0_2] : memref<24x1xi32, #tpu.memory_space<vmem>>, vector<24x1xi32>
    %7 = vector.broadcast %6 : vector<24x1xi32> to vector<24x16xi32>
    %8 = arith.cmpi eq, %0, %7 : vector<24x16xi32>
    %9 = arith.extui %8 : vector<24x16xi1> to vector<24x16xi32>
    %10 = arith.sitofp %9 : vector<24x16xi32> to vector<24x16xf32>
    %11 = tpu.iota {dimensions = array<i32: 0>} : vector<16x24xi32>
    %c0_3 = arith.constant 0 : index
    %c0_4 = arith.constant 0 : index
    %12 = vector.load %arg2[%c0_3, %c0_4] : memref<1x24xi32, #tpu.memory_space<vmem>>, vector<1x24xi32>
    %13 = vector.broadcast %12 : vector<1x24xi32> to vector<16x24xi32>
    %14 = arith.cmpi eq, %11, %13 : vector<16x24xi32>
    %15 = arith.extui %14 : vector<16x24xi1> to vector<16x24xi32>
    %16 = arith.sitofp %15 : vector<16x24xi32> to vector<16x24xf32>
    %c0_5 = arith.constant 0 : index
    %c0_6 = arith.constant 0 : index
    %17 = vector.load %arg3[%c0_5, %c0_6] : memref<1x24xi32, #tpu.memory_space<vmem>>, vector<1x24xi32>
    %18 = vector.broadcast %17 : vector<1x24xi32> to vector<16x24xi32>
    %19 = arith.cmpi eq, %11, %18 : vector<16x24xi32>
    %20 = arith.extui %19 : vector<16x24xi1> to vector<16x24xi32>
    %21 = arith.sitofp %20 : vector<16x24xi32> to vector<16x24xf32>
    %c0_7 = arith.constant 0 : index
    %c0_8 = arith.constant 0 : index
    %22 = vector.load %arg4[%c0_7, %c0_8] : memref<16x128xf32, #tpu.memory_space<vmem>>, vector<16x128xf32>
    %23 = arith.truncf %22 : vector<16x128xf32> to vector<16x128xbf16>
    %c0_9 = arith.constant 0 : index
    %c0_10 = arith.constant 0 : index
    %24 = vector.load %arg5[%c0_9, %c0_10] : memref<24x128xf32, #tpu.memory_space<vmem>>, vector<24x128xf32>
    %25 = arith.truncf %24 : vector<24x128xf32> to vector<24x128xbf16>
    %c0_11 = arith.constant 0 : index
    %c0_12 = arith.constant 0 : index
    %26 = vector.load %arg6[%c0_11, %c0_12] : memref<128x256xbf16, #tpu.memory_space<vmem>>, vector<128x256xbf16>
    %cst = arith.constant dense<0.000000e+00> : vector<16x256xf32>
    %27 = tpu.matmul %23, %26, %cst {dimension_numbers = #tpu.dot_dimension_numbers<[1], [0], [0], [1], [0, 0, 1, 1], [], []>} : vector<16x128xbf16>, vector<128x256xbf16>, vector<16x256xf32> -> vector<16x256xf32>
    %c0_13 = arith.constant 0 : index
    %c0_14 = arith.constant 0 : index
    %28 = vector.load %arg7[%c0_13, %c0_14] : memref<128x128xbf16, #tpu.memory_space<vmem>>, vector<128x128xbf16>
    %cst_15 = arith.constant dense<0.000000e+00> : vector<24x128xf32>
    %29 = tpu.matmul %25, %28, %cst_15 {dimension_numbers = #tpu.dot_dimension_numbers<[1], [0], [0], [1], [0, 0, 1, 1], [], []>} : vector<24x128xbf16>, vector<128x128xbf16>, vector<24x128xf32> -> vector<24x128xf32>
    %30 = vector.extract_strided_slice %27 {offsets = [0, 0], sizes = [16, 128], strides = [1, 1]} : vector<16x256xf32> to vector<16x128xf32>
    %cst_16 = arith.constant dense<0.000000e+00> : vector<24x128xf32>
    %31 = tpu.matmul %5, %30, %cst_16 {dimension_numbers = #tpu.dot_dimension_numbers<[1], [0], [0], [1], [0, 0, 1, 1], [], []>} : vector<24x16xf32>, vector<16x128xf32>, vector<24x128xf32> -> vector<24x128xf32>
    %32 = arith.addf %31, %29 : vector<24x128xf32>
    %33 = vector.extract_strided_slice %27 {offsets = [0, 128], sizes = [16, 128], strides = [1, 1]} : vector<16x256xf32> to vector<16x128xf32>
    %cst_17 = arith.constant dense<0.000000e+00> : vector<24x128xf32>
    %34 = tpu.matmul %10, %33, %cst_17 {dimension_numbers = #tpu.dot_dimension_numbers<[1], [0], [0], [1], [0, 0, 1, 1], [], []>} : vector<24x16xf32>, vector<16x128xf32>, vector<24x128xf32> -> vector<24x128xf32>
    %35 = arith.addf %32, %34 : vector<24x128xf32>
    %c0_18 = arith.constant 0 : index
    %c0_19 = arith.constant 0 : index
    %36 = vector.load %arg8[%c0_18, %c0_19] : memref<1x128xf32, #tpu.memory_space<vmem>>, vector<1x128xf32>
    %37 = vector.broadcast %36 : vector<1x128xf32> to vector<24x128xf32>
    %38 = arith.addf %35, %37 : vector<24x128xf32>
    %cst_20 = arith.constant 0.000000e+00 : f32
    %39 = vector.broadcast %cst_20 : f32 to vector<24x128xf32>
    %40 = arith.maximumf %38, %39 : vector<24x128xf32>
    %41 = arith.truncf %40 : vector<24x128xf32> to vector<24x128xbf16>
    %c0_21 = arith.constant 0 : index
    %c0_22 = arith.constant 0 : index
    %42 = vector.load %arg9[%c0_21, %c0_22] : memref<128x384xbf16, #tpu.memory_space<vmem>>, vector<128x384xbf16>
    %cst_23 = arith.constant dense<0.000000e+00> : vector<24x384xf32>
    %43 = tpu.matmul %41, %42, %cst_23 {dimension_numbers = #tpu.dot_dimension_numbers<[1], [0], [0], [1], [0, 0, 1, 1], [], []>} : vector<24x128xbf16>, vector<128x384xbf16>, vector<24x384xf32> -> vector<24x384xf32>
    %c0_24 = arith.constant 0 : index
    %c0_25 = arith.constant 0 : index
    %44 = vector.load %arg10[%c0_24, %c0_25] : memref<1x384xf32, #tpu.memory_space<vmem>>, vector<1x384xf32>
    %45 = vector.broadcast %44 : vector<1x384xf32> to vector<24x384xf32>
    %46 = arith.addf %43, %45 : vector<24x384xf32>
    %cst_26 = arith.constant 0.000000e+00 : f32
    %47 = vector.broadcast %cst_26 : f32 to vector<24x384xf32>
    %48 = arith.maximumf %46, %47 : vector<24x384xf32>
    %49 = vector.extract_strided_slice %48 {offsets = [0, 0], sizes = [24, 128], strides = [1, 1]} : vector<24x384xf32> to vector<24x128xf32>
    %50 = vector.extract_strided_slice %48 {offsets = [0, 128], sizes = [24, 128], strides = [1, 1]} : vector<24x384xf32> to vector<24x128xf32>
    %51 = vector.extract_strided_slice %48 {offsets = [0, 256], sizes = [24, 128], strides = [1, 1]} : vector<24x384xf32> to vector<24x128xf32>
    %c0_27 = arith.constant 0 : index
    %c0_28 = arith.constant 0 : index
    %52 = vector.load %arg16[%c0_27, %c0_28] : memref<24x128xf32, #tpu.memory_space<vmem>>, vector<24x128xf32>
    tpu.vector_store %arg16[%c0_27, %c0_28], %50 {strides = array<i32>} : memref<24x128xf32, #tpu.memory_space<vmem>>, vector<24x128xf32>,
    %cst_29 = arith.constant dense<0.000000e+00> : vector<16x128xf32>
    %53 = tpu.matmul %16, %49, %cst_29 {dimension_numbers = #tpu.dot_dimension_numbers<[1], [0], [0], [1], [0, 0, 1, 1], [], []>} : vector<16x24xf32>, vector<24x128xf32>, vector<16x128xf32> -> vector<16x128xf32>
    %cst_30 = arith.constant dense<0.000000e+00> : vector<16x128xf32>
    %54 = tpu.matmul %21, %51, %cst_30 {dimension_numbers = #tpu.dot_dimension_numbers<[1], [0], [0], [1], [0, 0, 1, 1], [], []>} : vector<16x24xf32>, vector<24x128xf32>, vector<16x128xf32> -> vector<16x128xf32>
    %55 = arith.addf %53, %54 : vector<16x128xf32>
    %cst_31 = arith.constant dense<0.000000e+00> : vector<16xf32>
    %56 = vector.multi_reduction <add>, %16, %cst_31 [1] : vector<16x24xf32> to vector<16xf32>
    %57 = vector.shape_cast %56 : vector<16xf32> to vector<16x1xf32>
    %cst_32 = arith.constant dense<0.000000e+00> : vector<16xf32>
    %58 = vector.multi_reduction <add>, %21, %cst_32 [1] : vector<16x24xf32> to vector<16xf32>
    %59 = vector.shape_cast %58 : vector<16xf32> to vector<16x1xf32>
    %60 = arith.addf %57, %59 : vector<16x1xf32>
    %cst_33 = arith.constant 1.000000e+00 : f32
    %61 = vector.broadcast %cst_33 : f32 to vector<16x1xf32>
    %62 = arith.maximumf %60, %61 : vector<16x1xf32>
    %63 = tpu.reciprocal %62 {approx = true} : vector<16x1xf32> -> vector<16x1xf32>
    %64 = vector.broadcast %63 : vector<16x1xf32> to vector<16x128xf32>
    %65 = arith.mulf %55, %64 : vector<16x128xf32>
    %66 = arith.truncf %65 : vector<16x128xf32> to vector<16x128xbf16>
    %c0_34 = arith.constant 0 : index
    %c0_35 = arith.constant 0 : index
    %67 = vector.load %arg11[%c0_34, %c0_35] : memref<128x128xbf16, #tpu.memory_space<vmem>>, vector<128x128xbf16>
    %cst_36 = arith.constant dense<0.000000e+00> : vector<16x128xf32>
    %68 = tpu.matmul %66, %67, %cst_36 {dimension_numbers = #tpu.dot_dimension_numbers<[1], [0], [0], [1], [0, 0, 1, 1], [], []>} : vector<16x128xbf16>, vector<128x128xbf16>, vector<16x128xf32> -> vector<16x128xf32>
    %c0_37 = arith.constant 0 : index
    %c0_38 = arith.constant 0 : index
    %69 = vector.load %arg12[%c0_37, %c0_38] : memref<1x128xf32, #tpu.memory_space<vmem>>, vector<1x128xf32>
    %70 = vector.broadcast %69 : vector<1x128xf32> to vector<16x128xf32>
    %71 = arith.addf %68, %70 : vector<16x128xf32>
    %cst_39 = arith.constant 0.000000e+00 : f32
    %72 = vector.broadcast %cst_39 : f32 to vector<16x128xf32>
    %73 = arith.maximumf %71, %72 : vector<16x128xf32>
    %74 = arith.truncf %73 : vector<16x128xf32> to vector<16x128xbf16>
    %c0_40 = arith.constant 0 : index
    %c0_41 = arith.constant 0 : index
    %75 = vector.load %arg13[%c0_40, %c0_41] : memref<128x128xbf16, #tpu.memory_space<vmem>>, vector<128x128xbf16>
    %cst_42 = arith.constant dense<0.000000e+00> : vector<16x128xf32>
    %76 = tpu.matmul %74, %75, %cst_42 {dimension_numbers = #tpu.dot_dimension_numbers<[1], [0], [0], [1], [0, 0, 1, 1], [], []>} : vector<16x128xbf16>, vector<128x128xbf16>, vector<16x128xf32> -> vector<16x128xf32>
    %c0_43 = arith.constant 0 : index
    %c0_44 = arith.constant 0 : index
    %77 = vector.load %arg14[%c0_43, %c0_44] : memref<1x128xf32, #tpu.memory_space<vmem>>, vector<1x128xf32>
    %78 = vector.broadcast %77 : vector<1x128xf32> to vector<16x128xf32>
    %79 = arith.addf %76, %78 : vector<16x128xf32>
    %cst_45 = arith.constant 0.000000e+00 : f32
    %80 = vector.broadcast %cst_45 : f32 to vector<16x128xf32>
    %81 = arith.maximumf %79, %80 : vector<16x128xf32>
    %c0_46 = arith.constant 0 : index
    %c0_47 = arith.constant 0 : index
    %82 = vector.load %arg15[%c0_46, %c0_47] : memref<16x128xf32, #tpu.memory_space<vmem>>, vector<16x128xf32>
    tpu.vector_store %arg15[%c0_46, %c0_47], %81 {strides = array<i32>} : memref<16x128xf32, #tpu.memory_space<vmem>>, vector<16x128xf32>,
    return
  }
}

</mosaic_0001>

<bundles_post_ra>
// kernel: tpu_custom_call.1
= control target key start
LH: loop header
LB: loop body
LE: loop exit
PB: predicated region body
PF: predicated region fallthrough
CT: control target
= control target key end

     0   :  { %s1789_s0 = inlined_call_operand.vmem [shape: s32[24,1], index: 0, kind: input, shape index: {}]   ;;  %s1790_s1 = inlined_call_operand.vmem [shape: s32[24,1], index: 1, kind: input, shape index: {}]   ;;  %s1791_s2 = inlined_call_operand.vmem [shape: s32[1,24], index: 2, kind: input, shape index: {}]   ;;  %s1792_s3 = inlined_call_operand.vmem [shape: s32[1,24], index: 3, kind: input, shape index: {}]   ;;  %s1793_s4 = inlined_call_operand.vmem [shape: f32[16,128], index: 4, kind: input, shape index: {}]   ;;  %s1794_s5 = inlined_call_operand.vmem [shape: f32[24,128], index: 5, kind: input, shape index: {}]   ;;  %s1795_s6 = inlined_call_operand.hbm [shape: bf16[128,256], index: 6, kind: input, shape index: {}]   ;;  %s1796_s7 = inlined_call_operand.hbm [shape: bf16[128,128], index: 7, kind: input, shape index: {}]   ;;  %s1797_s8 = inlined_call_operand.vmem [shape: f32[1,128], index: 8, kind: input, shape index: {}]   ;;  %s1798_s9 = inlined_call_operand.hbm [shape: bf16[128,384], index: 9, kind: input, shape index: {}]   ;;  %s1799_s10 = inlined_call_operand.vmem [shape: f32[1,384], index: 10, kind: input, shape index: {}]   ;;  %s1800_s11 = inlined_call_operand.hbm [shape: bf16[128,128], index: 11, kind: input, shape index: {}]   ;;  %s1801_s12 = inlined_call_operand.vmem [shape: f32[1,128], index: 12, kind: input, shape index: {}]   ;;  %s1802_s13 = inlined_call_operand.hbm [shape: bf16[128,128], index: 13, kind: input, shape index: {}]   ;;  %s1803_s14 = inlined_call_operand.vmem [shape: f32[1,128], index: 14, kind: input, shape index: {}]   ;;  %s1804_s15 = inlined_call_operand.hbm [shape: f32[16,128], index: 15, kind: output, shape index: {0}]   ;;  %s1805_s16 = inlined_call_operand.hbm [shape: f32[24,128], index: 16, kind: output, shape index: {1}]  }
   0x1   :  { %1807 = sst [smem:[#allocation19_spill]] %s1789_s0 }
   0x2   :  { %22 = vsyncpa [#allocation3], 0 }
   0x3   :  { %23 = vsyncpa [#allocation6], 0 }
   0x4   :  { %24 = vsyncpa [#allocation9], 0 }
   0x5   :  { %25 = vsyncpa [#allocation4], 0  ;;  %s56_s23 = sshll.u32 %s1796_s7, 4  ;;  %s57_s23 = int_to_ptr.hbm [resolvable:$true] %s56_s23 }
   0x6   :  { %26 = vsyncpa [#allocation13], 0  ;;  %s1564_s24 = smov [#allocation5]   ;;  %s86_s28 = sshll.u32 %s1800_s11, 4  ;;  %s87_s28 = int_to_ptr.hbm [resolvable:$true] %s86_s28 }
   0x7   :  { %s58_s25 = sshll.u32 %s1564_s24, 4  ;;  %s1565_s29 = smov 64   ;;  %s59_s25 = int_to_ptr.vmem [resolvable:$true] %s58_s25 }
   0x8   :  { %s1566_s30 = smov 4   ;;  %s1567_s0 = smov [#allocation8]  }
   0x9   :  { %64 = dma.hbm_to_vmem [thread:$0]  %s57_s23, 1024, %s59_s25, [#allocation6], %s1565_s29, %s1565_s29, %s1566_s30  }
   0xa   :  { %s88_s17 = sshll.u32 %s1567_s0, 4  ;;  %s43_s19 = sshll.u32 %s1795_s6, 4  ;;  %s89_s17 = int_to_ptr.vmem [resolvable:$true] %s88_s17  ;;  %s44_s19 = int_to_ptr.hbm [resolvable:$true] %s43_s19 }
   0xb   :  { %94 = dma.hbm_to_vmem [thread:$0]  %s87_s28, 1024, %s89_s17, [#allocation9], %s1565_s29, %s1565_s29, %s1566_s30  }
   0xc   :  { %s1568_s11 = smov [#allocation2]   ;;  %s71_s23 = sshll.u32 %s1798_s9, 4  ;;  %s72_s23 = int_to_ptr.hbm [resolvable:$true] %s71_s23 }
   0xd   :  { %s45_s20 = sshll.u32 %s1568_s11, 4  ;;  %s1569_s24 = smov 128   ;;  %s46_s20 = int_to_ptr.vmem [resolvable:$true] %s45_s20 }
   0xe   :  { %s1570_s25 = smov 8   ;;  %s1571_s6 = smov [#allocation7]  }
   0xf   :  { %51 = dma.hbm_to_vmem [thread:$0]  %s44_s19, 2048, %s46_s20, [#allocation3], %s1569_s24, %s1569_s24, %s1570_s25  }
  0x10   :  { %s73_s26 = sshll.u32 %s1571_s6, 4  ;;  %s1572_s27 = smov 192   ;;  %s74_s26 = int_to_ptr.vmem [resolvable:$true] %s73_s26 }
  0x11   :  { %s1573_s0 = smov 12   ;;  %s101_s18 = sshll.u32 %s1802_s13, 4  ;;  %s102_s18 = int_to_ptr.hbm [resolvable:$true] %s101_s18 }
  0x12   :  { %79 = dma.hbm_to_vmem [thread:$0]  %s72_s23, 3072, %s74_s26, [#allocation6], %s1572_s27, %s1572_s27, %s1573_s0  }
  0x13   :  { %s1574_s7 = smov [#allocation10]  }
  0x14   :  { %s103_s9 = sshll.u32 %s1574_s7, 4  ;;  %s104_s9 = int_to_ptr.vmem [resolvable:$true] %s103_s9 }
  0x15   :  { %109 = dma.hbm_to_vmem [thread:$0]  %s102_s18, 1024, %s104_s9, [#allocation9], %s1565_s29, %s1565_s29, %s1566_s30  }
  0x16   :  { %1554 = dma.done.wait [#allocation3], 2048  }
  0x17   :  { %1555 = vsyncadd [#allocation3], 4294965248 }
  0x18   :  { %1556 = dma.done.wait [#allocation6], 4096  }
  0x19   :  { %1557 = vsyncadd [#allocation6], 4294963200 }
  0x1a   :  { %1558 = dma.done.wait [#allocation9], 2048  }
  0x1b   :  { %1559 = vsyncadd [#allocation9], 4294965248  ;;  %v1087_v0 = vld [vmem:[#allocation2 + $0x70] sm:$0xf]  ;;  %v1310_v1 = vld [vmem:[#allocation2 + $0x74] sm:$0xf0] }
  0x1c   :  { %v1079_v2 = vld [vmem:[#allocation2 + $0x60] sm:$0xf]  ;;  %v1088_v3 = vor.u32 %v1310_v1, %v1087_v0  ;;  %v1308_v4 = vld [vmem:[#allocation2 + $0x64] sm:$0xf0]  ;;  %v1309_v5 = vld [vmem:[#allocation2 + $0x74] sm:$0xf] }
  0x1d   :  { %v1080_v6 = vor.u32 %v1308_v4, %v1079_v2  ;;  %v1071_v7 = vld [vmem:[#allocation2 + $0x50] sm:$0xf]  ;;  %v1089_v8 = vld [vmem:[#allocation2 + $0x78] sm:$0xf0]  ;;  %v1306_v9 = vld [vmem:[#allocation2 + $0x54] sm:$0xf0] }
  0x1e   :  { %299 = vmatpush.bf16.msra.mxu0 %v1088_v3  ;;  %v1092_v10 = vor.u32 %v1309_v5, %v1089_v8  ;;  %v1307_v11 = vld [vmem:[#allocation2 + $0x64] sm:$0xf]  ;;  %v1081_v12 = vld [vmem:[#allocation2 + $0x68] sm:$0xf0]  ;;  %v1072_v14 = vor.u32 %v1306_v9, %v1071_v7  ;;  %v1305_v15 = vld [vmem:[#allocation2 + $0x54] sm:$0xf]  ;;  %v132_v7 = vlaneseq }
  0x1f   :  { %v1084_v13 = vor.u32 %v1307_v11, %v1081_v12  ;;  %v1073_v16 = vld [vmem:[#allocation2 + $0x58] sm:$0xf0]  ;;  %v1063_v17 = vld [vmem:[#allocation2 + $0x40] sm:$0xf]  ;;  %v1304_v18 = vld [vmem:[#allocation2 + $0x44] sm:$0xf0] }
  0x20   :  { %313 = vmatpush.bf16.msra.mxu1 %v1092_v10  ;;  %v1575_v19 = vmov 0   ;;  %v1055_v20 = vld [vmem:[#allocation2 + $0x30] sm:$0xf]  ;;  %v1076_v21 = vor.u32 %v1305_v15, %v1073_v16  ;;  %v1064_v22 = vor.u32 %v1304_v18, %v1063_v17  ;;  %v1303_v23 = vld [vmem:[#allocation2 + $0x44] sm:$0xf]  ;;  %s1808_s30 = sld [smem:[#allocation19_spill]] }
  0x21   :  { %1374 = vset.pattern.permute.xlu0 %v1575_v19  ;;  %1375 = vset.pattern.permute.xlu1 %v1575_v19  ;;  %v1065_v24 = vld [vmem:[#allocation2 + $0x48] sm:$0xf0]  ;;  %v1302_v26 = vld [vmem:[#allocation2 + $0x34] sm:$0xf0]  ;;  %v1047_v30 = vld [vmem:[#allocation2 + $0x20] sm:$0xf] }
  0x22   :  { %300 = vmatpush.bf16.msra.mxu0 %v1080_v6  ;;  %1376 = vset.pattern.permute.xlu2 %v1575_v19  ;;  %v156_v28 = vld [vmem:[%s1790_s1 + $0x8] sm:$0xff]  ;;  %v1318_v29 = vld [vmem:[#allocation5 + $0x38] sm:$0xff]  ;;  %v1068_v31 = vor.u32 %v1303_v23, %v1065_v24  ;;  %v1301_v32 = vld [vmem:[#allocation2 + $0x34] sm:$0xf]  ;;  %v1056_v35 = vor.u32 %v1302_v26, %v1055_v20  ;;  %v133_v9 = vand.u32 127, %v132_v7  ;;  %vm409_vm1 = vcmask 130048  }
  0x23   :  { %162 = vperm.xlu2 %1376, %v156_v28   ;;  %v1057_v33 = vld [vmem:[#allocation2 + $0x38] sm:$0xf0]  ;;  %v1317_v34 = vld [vmem:[#allocation5 + $0x30] sm:$0xff]  ;;  %391 = vmatpush.bf16.msra.mxu2 %v1318_v29  ;;  %v1300_v36 = vld [vmem:[#allocation2 + $0x24] sm:$0xf0]  ;;  %vm729_vm8 = vcmask 195584  }
  0x24   :  { %314 = vmatpush.bf16.msra.mxu1 %v1084_v13  ;;  %v1060_v38 = vor.u32 %v1301_v32, %v1057_v33  ;;  %v155_v39 = vld [vmem:[%s1790_s1] sm:$0xff]  ;;  %v157_v40 = vld [vmem:[%s1790_s1 + $0x10] sm:$0xff]  ;;  %v1048_v41 = vor.u32 %v1300_v36, %v1047_v30  ;;  %v1049_v43 = vld [vmem:[#allocation2 + $0x28] sm:$0xf0]  ;;  %v1576_v13 = vmov 0.0   ;;  %s999_s0 = sshll.u32 %s1805_s16, 4  ;;  %s1000_s0 = int_to_ptr.hbm [resolvable:$true] %s999_s0 }
  0x25   :  { %v1299_v42 = vld [vmem:[#allocation2 + $0x24] sm:$0xf]  ;;  %v1316_v44 = vld [vmem:[#allocation5 + $0x28] sm:$0xff]  ;;  %v1039_v45 = vld [vmem:[#allocation2 + $0x10] sm:$0xf]  ;;  %s1578_s28 = smov [#allocation11]  }
  0x26   :  { %301 = vmatpush.bf16.msra.mxu0 %v1072_v14  ;;  %v134_v25 = vld [vmem:[%s1808_s30] sm:$0xff]  ;;  %v136_v27 = vld [vmem:[%s1808_s30 + $0x10] sm:$0xff]  ;;  %v135_v37 = vld [vmem:[%s1808_s30 + $0x8] sm:$0xff]  ;;  %v1052_v47 = vor.u32 %v1299_v42, %v1049_v43  ;;  %s984_s17 = sshll.u32 %s1578_s28, 4  ;;  %s986_s16 = sshll.u32 %s1804_s15, 4  ;;  %s985_s17 = int_to_ptr.vmem [resolvable:$true] %s984_s17  ;;  %s987_s16 = int_to_ptr.hbm [resolvable:$true] %s986_s16 }
  0x27   :  { %138 = vperm.xlu0 %1374, %v134_v25   ;;  %144 = vperm.xlu1 %1375, %v136_v27   ;;  %v1298_v46 = vld [vmem:[#allocation2 + $0x14] sm:$0xf0]  ;;  %v1297_v49 = vld [vmem:[#allocation2 + $0x14] sm:$0xf]  ;;  %v1041_v50 = vld [vmem:[#allocation2 + $0x18] sm:$0xf0] }
  0x28   :  { %315 = vmatpush.bf16.msra.mxu1 %v1076_v21  ;;  %392 = vmatpush.bf16.msra.mxu2 %v1317_v34  ;;  %v1040_v48 = vor.u32 %v1298_v46, %v1039_v45  ;;  %v1315_v51 = vld [vmem:[#allocation5 + $0x20] sm:$0xff]  ;;  %v1296_v53 = vld [vmem:[#allocation2 + $0x4] sm:$0xf0]  ;;  %v1044_v56 = vor.u32 %v1297_v49, %v1041_v50  ;;  %v1033_v59 = vld [vmem:[#allocation2 + $0x8] sm:$0xf0] }
  0x29   :  { %v1031_v52 = vld [vmem:[#allocation2] sm:$0xf]  ;;  %v196_v55 = vld [vmem:[%s1793_s4 + $0x8] sm:$0xff]  ;;  %v1295_v58 = vld [vmem:[#allocation2 + $0x4] sm:$0xf] }
  0x2a   :  { %302 = vmatpush.bf16.msra.mxu0 %v1064_v22  ;;  %v195_v54 = vld [vmem:[%s1793_s4] sm:$0xff]  ;;  %v1032_v57 = vor.u32 %v1296_v53, %v1031_v52  ;;  %v1314_v60 = vld [vmem:[#allocation5 + $0x18] sm:$0xff]  ;;  %v1036_v62 = vor.u32 %v1295_v58, %v1033_v59  ;;  %v1313_v63 = vld [vmem:[#allocation5 + $0x10] sm:$0xff] }
  0x2b   :  { %165 = vperm.xlu2 %1376, %v157_v40   ;;  %v197_v61 = vpack.c.bf16 %v196_v55, %v195_v54  ;;  %v1312_v0 = vld [vmem:[#allocation5 + $0x8] sm:$0xff]  ;;  %v1311_v1 = vld [vmem:[#allocation5] sm:$0xff]  ;;  %v200_v5 = vld [vmem:[%s1794_s5 + $0x10] sm:$0xff] }
  0x2c   :  { %316 = vmatpush.bf16.msra.mxu1 %v1068_v31  ;;  %393 = vmatpush.bf16.msra.mxu2 %v1316_v44  ;;  %v198_v2 = vld [vmem:[%s1794_s5] sm:$0xff]  ;;  %v199_v3 = vld [vmem:[%s1794_s5 + $0x8] sm:$0xff]  ;;  %v202_v6 = vpack.c.bf16 %v200_v5, %v200_v5  ;;  %v1341_v28 = vld [vmem:[#allocation7 + $0xb0] sm:$0xf0] }
  0x2d   :  { %v201_v4 = vpack.c.bf16 %v199_v3, %v198_v2  ;;  %v1217_v27 = vld [vmem:[#allocation7 + $0xa8] sm:$0xf]  ;;  %v1340_v29 = vld [vmem:[#allocation7 + $0xac] sm:$0xf]  ;;  %v1219_v32 = vld [vmem:[#allocation7 + $0xb4] sm:$0xf0] }
  0x2e   :  { %303 = vmatpush.bf16.msra.mxu0 %v1056_v35  ;;  %v1218_v31 = vor.u32 %v1341_v28, %v1217_v27  ;;  %v1225_v33 = vld [vmem:[#allocation7 + $0xb0] sm:$0xf]  ;;  %v1342_v34 = vld [vmem:[#allocation7 + $0xb8] sm:$0xf0]  ;;  %v1222_v35 = vor.u32 %v1340_v29, %v1219_v32  ;;  %v1213_v42 = vld [vmem:[#allocation7 + $0x98] sm:$0xf] }
  0x2f   :  { %141 = vperm.xlu0 %1374, %v135_v37   ;;  %159 = vperm.xlu1 %1375, %v155_v39   ;;  %v1226_v36 = vor.u32 %v1342_v34, %v1225_v33  ;;  %v1205_v37 = vld [vmem:[#allocation7 + $0x90] sm:$0xf]  ;;  %v1337_v39 = vld [vmem:[#allocation7 + $0x94] sm:$0xf]  ;;  %v1339_v43 = vld [vmem:[#allocation7 + $0xa0] sm:$0xf0] }
  0x30   :  { %317 = vmatpush.bf16.msra.mxu1 %v1060_v38  ;;  %394 = vmatpush.bf16.msra.mxu2 %v1315_v51  ;;  %v1338_v38 = vld [vmem:[#allocation7 + $0x98] sm:$0xf0]  ;;  %v1214_v45 = vor.u32 %v1339_v43, %v1213_v42  ;;  %v1193_v46 = vld [vmem:[#allocation7 + $0x78] sm:$0xf]  ;;  %v1195_v51 = vld [vmem:[#allocation7 + $0x84] sm:$0xf0] }
  0x31   :  { %v1206_v40 = vor.u32 %v1338_v38, %v1205_v37  ;;  %v1201_v52 = vld [vmem:[#allocation7 + $0x80] sm:$0xf]  ;;  %v1336_v53 = vld [vmem:[#allocation7 + $0x88] sm:$0xf0]  ;;  %v1331_v58 = vld [vmem:[#allocation7 + $0x64] sm:$0xf] }
  0x32   :  { %304 = vmatpush.bf16.msra.mxu0 %v1048_v41  ;;  %v1207_v41 = vld [vmem:[#allocation7 + $0x9c] sm:$0xf0]  ;;  %v1202_v55 = vor.u32 %v1336_v53, %v1201_v52  ;;  %v1329_v2 = vld [vmem:[#allocation7 + $0x50] sm:$0xf0]  ;;  %v1328_v3 = vld [vmem:[#allocation7 + $0x4c] sm:$0xf] }
  0x33   :  { %v1210_v44 = vor.u32 %v1337_v39, %v1207_v41  ;;  %v1171_v5 = vld [vmem:[#allocation7 + $0x54] sm:$0xf0]  ;;  %v1147_v28 = vld [vmem:[#allocation7 + $0x24] sm:$0xf0]  ;;  %v1153_v29 = vld [vmem:[#allocation7 + $0x20] sm:$0xf] }
  0x34   :  { %318 = vmatpush.bf16.msra.mxu1 %v1052_v47  ;;  %395 = vmatpush.bf16.msra.mxu2 %v1314_v60  ;;  %v1335_v47 = vld [vmem:[#allocation7 + $0x80] sm:$0xf0]  ;;  %v1183_v60 = vld [vmem:[#allocation7 + $0x6c] sm:$0xf0]  ;;  %v1133_v34 = vld [vmem:[#allocation7] sm:$0xf] }
  0x35   :  { %v1194_v50 = vor.u32 %v1335_v47, %v1193_v46  ;;  %v1135_v38 = vld [vmem:[#allocation7 + $0xc] sm:$0xf0]  ;;  %v1141_v39 = vld [vmem:[#allocation7 + $0x8] sm:$0xf] }
  0x36   :  { %305 = vmatpush.bf16.msra.mxu0 %v1040_v48  ;;  %v1334_v48 = vld [vmem:[#allocation7 + $0x7c] sm:$0xf] }
  0x37   :  { %v1198_v54 = vor.u32 %v1334_v48, %v1195_v51  ;;  %v1377_v48 = vld [vmem:[%s1797_s8] ss:$0 sm:$0xff] }
  0x38   :  { %319 = vmatpush.bf16.msra.mxu1 %v1044_v56  ;;  %396 = vmatpush.bf16.msra.mxu2 %v1313_v63  ;;  %v1181_v56 = vld [vmem:[#allocation7 + $0x60] sm:$0xf]  ;;  %v1186_v63 = vor.u32 %v1331_v58, %v1183_v60 }
  0x3a   :  { %306 = vmatpush.bf16.msra.mxu0 %v1032_v57  ;;  %v1332_v57 = vld [vmem:[#allocation7 + $0x68] sm:$0xf0] }
  0x3b   :  { %v1182_v59 = vor.u32 %v1332_v57, %v1181_v56 }
  0x3c   :  { %320 = vmatpush.bf16.msra.mxu1 %v1036_v62  ;;  %397 = vmatpush.bf16.msra.mxu2 %v1312_v0  ;;  %v1333_v62 = vld [vmem:[#allocation7 + $0x70] sm:$0xf0] }
  0x3d   :  { %307 = vmatmul.bf16.vlgmr.msra.gmra.mxu0 %v197_v61 }
  0x3e   :  { %681 = vmatpush.bf16.msrb.mxu0 %v1222_v35  ;;  %v1320_v35 = vld [vmem:[#allocation7 + $0x8] sm:$0xf0] }
  0x3f   :  { %321 = vmatmul.bf16.vlgmr.msra.gmra.mxu1 %v197_v61  ;;  %v1189_v61 = vld [vmem:[#allocation7 + $0x68] sm:$0xf]  ;;  %v1134_v37 = vor.u32 %v1320_v35, %v1133_v34 }
  0x40   :  { %398 = vmatpush.bf16.msra.mxu2 %v1311_v1  ;;  %699 = vmatpush.bf16.msrb.mxu1 %v1226_v36  ;;  %v1190_v0 = vor.u32 %v1333_v62, %v1189_v61  ;;  %v1169_v1 = vld [vmem:[#allocation7 + $0x48] sm:$0xf]  ;;  %v1319_v36 = vld [vmem:[#allocation7 + $0x4] sm:$0xf] }
  0x41   :  { %v1138_v41 = vor.u32 %v1319_v36, %v1135_v38 }
  0x42   :  { %682 = vmatpush.bf16.msrb.mxu0 %v1210_v44 }
  0x43   :  { %399 = vmatmul.bf16.vlgmr.msra.gmra.mxu2 %v201_v4  ;;  %v1170_v4 = vor.u32 %v1329_v2, %v1169_v1 }
  0x44   :  { %700 = vmatpush.bf16.msrb.mxu1 %v1214_v45 }
  0x46   :  { %683 = vmatpush.bf16.msrb.mxu0 %v1198_v54 }
  0x48   :  { %701 = vmatpush.bf16.msrb.mxu1 %v1202_v55 }
  0x4a   :  { %684 = vmatpush.bf16.msrb.mxu0 %v1186_v63 }
  0x4c   :  { %702 = vmatpush.bf16.msrb.mxu1 %v1190_v0 }
  0x53   :  { %404 = vmatmul.bf16.gmra.mxu2 %v202_v6  ;;  %v1177_v6 = vld [vmem:[#allocation7 + $0x50] sm:$0xf] }
  0x7d   :  { %v163_v22 = vpop.permute.xlu2 %162 }
  0x7e   :  { %vm168_vm5 = vcmp.eq.s32.totalorder %v133_v9, %v163_v22  ;;  %v1145_v22 = vld [vmem:[#allocation7 + $0x18] sm:$0xf] }
  0x7f   :  { %v1023_v23 = vsel %vm168_vm5, 1.0, %v1576_v13 }
  0x85   :  { %v166_v24 = vpop.permute.xlu2 %165 }
  0x86   :  { %vm169_vm6 = vcmp.eq.s32.totalorder %v133_v9, %v166_v24  ;;  %v1322_v24 = vld [vmem:[#allocation7 + $0x1c] sm:$0xf] }
  0x87   :  { %v1024_v25 = vsel %vm169_vm6, 1.0, %v1576_v13  ;;  %v1150_v32 = vor.u32 %v1322_v24, %v1147_v28 }
  0x99   :  { %v139_v10 = vpop.permute.xlu0 %138  ;;  %v145_v18 = vpop.permute.xlu1 %144 }
  0x9a   :  { %vm146_vm0 = vcmp.eq.s32.totalorder %v133_v9, %v139_v10  ;;  %vm148_vm3 = vcmp.eq.s32.totalorder %v133_v9, %v145_v18  ;;  %v1174_v10 = vor.u32 %v1328_v3, %v1171_v5  ;;  %v1165_v18 = vld [vmem:[#allocation7 + $0x38] sm:$0xf] }
  0x9b   :  { %v1019_v14 = vsel %vm146_vm0, 1.0, %v1576_v13  ;;  %v1021_v19 = vsel %vm148_vm3, 1.0, %v1576_v13 }
  0x9c   :  { %685 = vmatpush.bf16.msrb.mxu0 %v1174_v10  ;;  %v1379_v10 = vld [vmem:[%s1791_s2] ss:$0 sm:$0xff] }
  0xa1   :  { %v142_v16 = vpop.permute.xlu0 %141  ;;  %v160_v20 = vpop.permute.xlu1 %159 }
  0xa2   :  { %vm147_vm2 = vcmp.eq.s32.totalorder %v133_v9, %v142_v16  ;;  %vm167_vm4 = vcmp.eq.s32.totalorder %v133_v9, %v160_v20 }
  0xa3   :  { %v1020_v17 = vsel %vm147_vm2, 1.0, %v1576_v13  ;;  %v1022_v21 = vsel %vm167_vm4, 1.0, %v1576_v13 }
  0xba   :  { %v308_v8 = vpop.f32.mrf.mxu0 }
  0xbc   :  { %v322_v11 = vpop.f32.mrf.mxu1 }
  0xc2   :  { %v310_v12 = vpop.f32.mrf.mxu0 }
  0xc3   :  { %433 = vmatpush.msra.mxu3 %v310_v12  ;;  %v1157_v12 = vld [vmem:[#allocation7 + $0x30] sm:$0xf] }
  0xc4   :  { %v324_v15 = vpop.f32.mrf.mxu1 }
  0xc5   :  { %434 = vmatpush.msra.mxu3 %v308_v8  ;;  %v1330_v8 = vld [vmem:[#allocation7 + $0x58] sm:$0xf0] }
  0xc6   :  { %1125 = vmatmul.msk.f32.vlgmr.msra.gmra.mxu3 %vm409_vm1, %v1019_v14  ;;  %v1737_v26 = vpop.f32.mrf.mxu2  ;;  %v1326_v14 = vld [vmem:[#allocation7 + $0x38] sm:$0xf0] }
  0xc7   :  { %468 = vmatpush.msrb.mxu3 %v324_v15  ;;  %v1325_v15 = vld [vmem:[#allocation7 + $0x34] sm:$0xf]  ;;  %v1158_v16 = vor.u32 %v1326_v14, %v1157_v12 }
  0xc9   :  { %469 = vmatpush.msrb.mxu3 %v322_v11  ;;  %v1178_v11 = vor.u32 %v1330_v8, %v1177_v6 }
  0xcb   :  { %663 = vmatpush.bf16.msra.mxu3 %v1218_v31  ;;  %703 = vmatpush.bf16.msrb.mxu1 %v1178_v11  ;;  %v1324_v31 = vld [vmem:[#allocation7 + $0x28] sm:$0xf0] }
  0xcc   :  { %v1154_v33 = vor.u32 %v1324_v31, %v1153_v29 }
  0xce   :  { %1126 = vmatmul.msk.f32.gmra.mxu3 %vm409_vm1, %v1020_v17  ;;  %v1739_v30 = vpop.f32.mrf.mxu2  ;;  %v1159_v17 = vld [vmem:[#allocation7 + $0x3c] sm:$0xf0] }
  0xcf   :  { %664 = vmatpush.bf16.msra.mxu3 %v1206_v40  ;;  %v1162_v20 = vor.u32 %v1325_v15, %v1159_v17  ;;  %v1321_v40 = vld [vmem:[#allocation7 + $0x10] sm:$0xf0] }
  0xd0   :  { %v1142_v42 = vor.u32 %v1321_v40, %v1141_v39 }
  0xd1   :  { %686 = vmatpush.bf16.msrb.mxu0 %v1162_v20 }
  0xd3   :  { %665 = vmatpush.bf16.msra.mxu3 %v1194_v50 }
  0xd5   :  { %687 = vmatpush.bf16.msrb.mxu0 %v1150_v32 }
  0xd6   :  { %1127 = vmatmul.msk.f32.gmra.mxu3 %vm409_vm1, %v1021_v19  ;;  %v1741_v49 = vpop.f32.mrf.mxu2  ;;  %v1327_v19 = vld [vmem:[#allocation7 + $0x40] sm:$0xf0] }
  0xd7   :  { %666 = vmatpush.bf16.msra.mxu3 %v1182_v59 }
  0xd9   :  { %688 = vmatpush.bf16.msrb.mxu0 %v1138_v41 }
  0xdb   :  { %667 = vmatpush.bf16.msra.mxu3 %v1170_v4  ;;  %v1378_v4 = vld [vmem:[%s1792_s3] ss:$0 sm:$0xff] }
  0xde   :  { %1128 = vmatmul.msk.f32.vlgmr.msrb.gmra.mxu3 %vm409_vm1, %v1022_v21  ;;  %v407_v9 = vpop.f32.mrf.mxu2  ;;  %v1166_v21 = vor.u32 %v1327_v19, %v1165_v18 }
  0xdf   :  { %668 = vmatpush.bf16.msra.mxu3 %v1158_v16 }
  0xe0   :  { %704 = vmatpush.bf16.msrb.mxu1 %v1166_v21 }
  0xe4   :  { %705 = vmatpush.bf16.msrb.mxu1 %v1154_v33 }
  0xe6   :  { %1129 = vmatmul.msk.f32.gmra.mxu3 %vm409_vm1, %v1023_v23  ;;  %v1323_v23 = vld [vmem:[#allocation7 + $0x20] sm:$0xf0] }
  0xe7   :  { %v1146_v27 = vor.u32 %v1323_v23, %v1145_v22 }
  0xe8   :  { %706 = vmatpush.bf16.msrb.mxu1 %v1142_v42 }
  0xe9   :  { %669 = vmatpush.bf16.msra.mxu3 %v1146_v27 }
  0xed   :  { %670 = vmatpush.bf16.msra.mxu3 %v1134_v37 }
  0xee   :  { %1130 = vmatmul.msk.f32.gmra.mxu3 %vm409_vm1, %v1024_v25 }
 0x149   :  { %v436_v25 = vpop.f32.mrf.mxu3 }
 0x14a   :  { %v437_v46 = vadd.f32 %v436_v25, %v1737_v26 }
 0x151   :  { %v439_v43 = vpop.f32.mrf.mxu3 }
 0x152   :  { %v440_v50 = vadd.f32 %v439_v43, %v1739_v30  ;;  %v527_v30 = vld [vmem:[%s1799_s10] sm:$0x7]  ;;  %s1577_s10 = smov [#allocation12]  }
 0x153   :  { %v530_v63 = vperm.slane %v527_v30, 1  ;;  %v531_v16 = vperm.slane %v527_v30, 2  ;;  %v529_v33 = vperm.slane %v527_v30, 0  ;;  %v1355_v30 = vld [vmem:[#allocation10 + $0x20] sm:$0xff]  ;;  %s997_s6 = sshll.u32 %s1577_s10, 4  ;;  %s998_s6 = int_to_ptr.vmem [resolvable:$true] %s997_s6 }
 0x159   :  { %v442_v44 = vpop.f32.mrf.mxu3 }
 0x15a   :  { %v443_v59 = vadd.f32 %v442_v44, %v1741_v49  ;;  %v177_v49 = vshrl.u32 %v132_v7, 7 }
 0x15c   :  { %vm189_vm7 = vcmp.eq.s32.totalorder %v177_v49, %v1378_v4  ;;  %v178_v14 = vadd.s32 8, %v177_v49  ;;  %vm181_vm9 = vcmp.eq.s32.totalorder %v177_v49, %v1379_v10 }
 0x15d   :  { %v1027_v11 = vsel %vm189_vm7, 1.0, %v1576_v13  ;;  %v1025_v18 = vsel %vm181_vm9, 1.0, %v1576_v13 }
 0x15e   :  { %v794_v7 = vsel %vm729_vm8, %v1027_v11, 0.0  ;;  %vm190_vm10 = vcmp.eq.s32.totalorder %v178_v14, %v1378_v4  ;;  %vm182_vm11 = vcmp.eq.s32.totalorder %v178_v14, %v1379_v10  ;;  %v788_v21 = vsel %vm729_vm8, %v1025_v18, 0.0  ;;  %v1352_v14 = vld [vmem:[#allocation10 + $0x8] sm:$0xff] }
 0x15f   :  { %795 = vadd.xlane.f32.xlu2 %v794_v7  ;;  %v1028_v24 = vsel %vm190_vm10, 1.0, %v1576_v13  ;;  %v1026_v25 = vsel %vm182_vm11, 1.0, %v1576_v13  ;;  %789 = vadd.xlane.f32.xlu0 %v788_v21  ;;  %v1351_v7 = vld [vmem:[#allocation10] sm:$0xff] }
 0x160   :  { %v797_v28 = vsel %vm729_vm8, %v1028_v24, 0.0  ;;  %v791_v29 = vsel %vm729_vm8, %v1026_v25, 0.0 }
 0x161   :  { %v471_v45 = vpop.f32.mrf.mxu3  ;;  %792 = vadd.xlane.f32.xlu1 %v791_v29 }
 0x162   :  { %v480_v47 = vadd.f32 %v471_v45, %v437_v46  ;;  %v1350_v45 = vld [vmem:[#allocation8 + $0x38] sm:$0xff]  ;;  %v1349_v46 = vld [vmem:[#allocation8 + $0x30] sm:$0xff] }
 0x163   :  { %877 = vmatpush.bf16.msrb.mxu3 %v1350_v45 }
 0x164   :  { %v487_v52 = vadd.f32 %v1377_v48, %v480_v47  ;;  %v1348_v47 = vld [vmem:[#allocation8 + $0x28] sm:$0xff] }
 0x166   :  { %v490_v55 = vmax.f32 %v487_v52, 0.0  ;;  %v1344_v52 = vld [vmem:[#allocation8 + $0x8] sm:$0xff] }
 0x167   :  { %798 = vadd.xlane.f32.xlu2 %v797_v28  ;;  %878 = vmatpush.bf16.msrb.mxu3 %v1349_v46 }
 0x169   :  { %v474_v51 = vpop.f32.mrf.mxu3 }
 0x16a   :  { %v481_v53 = vadd.f32 %v474_v51, %v440_v50  ;;  %v1346_v50 = vld [vmem:[#allocation8 + $0x18] sm:$0xff]  ;;  %v1345_v51 = vld [vmem:[#allocation8 + $0x10] sm:$0xff] }
 0x16b   :  { %879 = vmatpush.bf16.msrb.mxu3 %v1348_v47 }
 0x16c   :  { %v488_v54 = vadd.f32 %v1377_v48, %v481_v53  ;;  %v1343_v53 = vld [vmem:[#allocation8] sm:$0xff] }
 0x16e   :  { %v491_v56 = vmax.f32 %v488_v54, 0.0 }
 0x170   :  { %v493_v57 = vpack.c.bf16 %v491_v56, %v490_v55  ;;  %v1358_v55 = vld [vmem:[#allocation10 + $0x38] sm:$0xff] }
 0x171   :  { %v477_v58 = vpop.f32.mrf.mxu3  ;;  %962 = vmatpush.bf16.msra.mxu0 %v1358_v55 }
 0x172   :  { %671 = vmatmul.bf16.vlgmr.msra.gmra.mxu3 %v493_v57  ;;  %689 = vmatmul.bf16.vlgmr.msrb.gmra.mxu0 %v493_v57  ;;  %v482_v26 = vadd.f32 %v477_v58, %v443_v59  ;;  %v1356_v58 = vld [vmem:[#allocation10 + $0x28] sm:$0xff] }
 0x173   :  { %707 = vmatmul.bf16.vlgmr.msrb.gmra.mxu1 %v493_v57  ;;  %v1357_v57 = vld [vmem:[#allocation10 + $0x30] sm:$0xff] }
 0x174   :  { %v489_v60 = vadd.f32 %v1377_v48, %v482_v26  ;;  %v1347_v48 = vld [vmem:[#allocation8 + $0x20] sm:$0xff] }
 0x175   :  { %880 = vmatpush.bf16.msrb.mxu3 %v1347_v48  ;;  %963 = vmatpush.bf16.msra.mxu0 %v1357_v57 }
 0x176   :  { %v492_v61 = vmax.f32 %v489_v60, 0.0 }
 0x178   :  { %v494_v62 = vpack.c.bf16 %v492_v61, %v492_v61 }
 0x179   :  { %881 = vmatpush.bf16.msrb.mxu3 %v1346_v50  ;;  %964 = vmatpush.bf16.msra.mxu0 %v1356_v58 }
 0x17d   :  { %882 = vmatpush.bf16.msrb.mxu3 %v1345_v51  ;;  %965 = vmatpush.bf16.msra.mxu0 %v1355_v30 }
 0x181   :  { %883 = vmatpush.bf16.msrb.mxu3 %v1344_v52 }
 0x182   :  { %676 = vmatmul.bf16.gmra.mxu3 %v494_v62  ;;  %694 = vmatmul.bf16.gmra.mxu0 %v494_v62 }
 0x183   :  { %712 = vmatmul.bf16.gmra.mxu1 %v494_v62 }
 0x185   :  { %884 = vmatpush.bf16.msrb.mxu3 %v1343_v53 }
 0x1d2   :  { %v796_v54 = vpop.xlane.xlu2 %795  ;;  %v790_v59 = vpop.xlane.xlu0 %789 }
 0x1d3   :  { %v800_v62 = vadd.f32 %v796_v54, %v790_v59 }
 0x1d4   :  { %v793_v60 = vpop.xlane.xlu1 %792 }
 0x1da   :  { %v799_v26 = vpop.xlane.xlu2 %798 }
 0x1ef   :  { %v690_v0 = vpop.f32.mrf.mxu0 }
 0x1f0   :  { %v691_v1 = vadd.f32 %v690_v0, %v530_v63  ;;  %v708_v2 = vpop.f32.mrf.mxu1  ;;  %v802_v0 = vmax.f32 %v800_v62, 1.0 }
 0x1f1   :  { %v709_v31 = vadd.f32 %v708_v2, %v531_v16 }
 0x1f2   :  { %v718_v3 = vmax.f32 %v691_v1, 0.0  ;;  %1382 = vrcp.f32 %v802_v0 }
 0x1f3   :  { %v719_v37 = vmax.f32 %v709_v31, 0.0 }
 0x1f4   :  { %726 = vst [vmem:[#allocation12] sm:$0xff] %v718_v3 }
 0x1f5   :  { %v672_v5 = vpop.f32.mrf.mxu3 }
 0x1f6   :  { %v673_v41 = vadd.f32 %v672_v5, %v529_v33 }
 0x1f7   :  { %v692_v6 = vpop.f32.mrf.mxu0 }
 0x1f8   :  { %v693_v8 = vadd.f32 %v692_v6, %v530_v63  ;;  %v710_v9 = vpop.f32.mrf.mxu1  ;;  %v717_v43 = vmax.f32 %v673_v41, 0.0  ;;  %v1383_v3 = vpop.eup %1382 }
 0x1f9   :  { %v711_v22 = vadd.f32 %v710_v9, %v531_v16 }
 0x1fa   :  { %v721_v12 = vmax.f32 %v693_v8, 0.0 }
 0x1fb   :  { %v722_v34 = vmax.f32 %v711_v22, 0.0 }
 0x1fc   :  { %727 = vst [vmem:[#allocation12 + $0x8] sm:$0xff] %v721_v12  ;;  %v1353_v12 = vld [vmem:[#allocation10 + $0x10] sm:$0xff] }
 0x1fd   :  { %v674_v15 = vpop.f32.mrf.mxu3 }
 0x1fe   :  { %v675_v38 = vadd.f32 %v674_v15, %v529_v33 }
 0x1ff   :  { %v695_v17 = vpop.f32.mrf.mxu0 }
 0x200   :  { %v696_v19 = vadd.f32 %v695_v17, %v530_v63  ;;  %v713_v20 = vpop.f32.mrf.mxu1  ;;  %v720_v42 = vmax.f32 %v675_v38, 0.0  ;;  %v801_v63 = vadd.f32 %v799_v26, %v793_v60 }
 0x201   :  { %v714_v23 = vadd.f32 %v713_v20, %v531_v16  ;;  %v1380_v16 = vld [vmem:[%s1801_s12] ss:$0 sm:$0xff] }
 0x202   :  { %v724_v27 = vmax.f32 %v696_v19, 0.0  ;;  %v803_v1 = vmax.f32 %v801_v63, 1.0 }
 0x203   :  { %v725_v32 = vmax.f32 %v714_v23, 0.0  ;;  %v1381_v23 = vld [vmem:[%s1803_s14] ss:$0 sm:$0xff] }
 0x204   :  { %728 = vst [vmem:[#allocation12 + $0x10] sm:$0xff] %v724_v27  ;;  %1384 = vrcp.f32 %v803_v1 }
 0x205   :  { %749 = vmatpush.msrb.mxu2 %v725_v32  ;;  %v677_v35 = vpop.f32.mrf.mxu3  ;;  %1005 = dma.vmem_to_hbm [thread:$0]  %s998_s6, 384, %s1000_s0, [#allocation13], %s1569_s24, %s1569_s24, %s1570_s25  }
 0x206   :  { %v678_v36 = vadd.f32 %v677_v35, %v529_v33 }
 0x207   :  { %750 = vmatpush.msrb.mxu2 %v722_v34  ;;  %v697_v13 = vpop.f32.mrf.mxu0 }
 0x208   :  { %v723_v39 = vmax.f32 %v678_v36, 0.0  ;;  %v715_v40 = vpop.f32.mrf.mxu1 }
 0x209   :  { %751 = vmatpush.msrb.mxu2 %v719_v37 }
 0x20a   :  { %1227 = vmatmul.msk.f32.vlgmr.msrb.gmra.mxu2 %vm729_vm8, %v1027_v11  ;;  %v1385_v4 = vpop.eup %1384  ;;  %v1354_v11 = vld [vmem:[#allocation10 + $0x18] sm:$0xff] }
 0x20b   :  { %778 = vmatpush.msra.mxu2 %v723_v39  ;;  %966 = vmatpush.bf16.msra.mxu0 %v1354_v11 }
 0x20d   :  { %779 = vmatpush.msra.mxu2 %v720_v42  ;;  %v679_v44 = vpop.f32.mrf.mxu3 }
 0x20f   :  { %780 = vmatpush.msra.mxu2 %v717_v43  ;;  %967 = vmatpush.bf16.msra.mxu0 %v1353_v12 }
 0x212   :  { %1228 = vmatmul.msk.f32.gmra.mxu2 %vm729_vm8, %v1028_v24 }
 0x213   :  { %968 = vmatpush.bf16.msra.mxu0 %v1352_v14 }
 0x217   :  { %969 = vmatpush.bf16.msra.mxu0 %v1351_v7 }
 0x21a   :  { %1229 = vmatmul.msk.f32.vlgmr.msra.gmra.mxu2 %vm729_vm8, %v1025_v18 }
 0x222   :  { %1230 = vmatmul.msk.f32.gmra.mxu2 %vm729_vm8, %v1026_v25 }
 0x28d   :  { %v753_v56 = vpop.f32.mrf.mxu2 }
 0x295   :  { %v756_v61 = vpop.f32.mrf.mxu2 }
 0x29d   :  { %v782_v2 = vpop.f32.mrf.mxu2 }
 0x29e   :  { %v783_v49 = vadd.f32 %v782_v2, %v753_v56 }
 0x2a0   :  { %v806_v8 = vmul.f32 %v1383_v3, %v783_v49 }
 0x2a5   :  { %v785_v5 = vpop.f32.mrf.mxu2 }
 0x2a6   :  { %v786_v6 = vadd.f32 %v785_v5, %v756_v61 }
 0x2a8   :  { %v807_v9 = vmul.f32 %v1385_v4, %v786_v6 }
 0x2aa   :  { %v808_v10 = vpack.c.bf16 %v807_v9, %v806_v8 }
 0x2ac   :  { %885 = vmatmul.bf16.vlgmr.msrb.gmra.mxu3 %v808_v10 }
 0x32f   :  { %v886_v15 = vpop.f32.mrf.mxu3 }
 0x330   :  { %v887_v17 = vadd.f32 %v1380_v16, %v886_v15 }
 0x332   :  { %v891_v20 = vmax.f32 %v887_v17, 0.0 }
 0x337   :  { %v888_v18 = vpop.f32.mrf.mxu3 }
 0x338   :  { %v889_v19 = vadd.f32 %v1380_v16, %v888_v18 }
 0x33a   :  { %v892_v21 = vmax.f32 %v889_v19, 0.0 }
 0x33c   :  { %v893_v22 = vpack.c.bf16 %v892_v21, %v891_v20 }
 0x33e   :  { %970 = vmatmul.bf16.vlgmr.msra.gmra.mxu0 %v893_v22 }
 0x3bb   :  { %v971_v24 = vpop.f32.mrf.mxu0 }
 0x3bc   :  { %v972_v25 = vadd.f32 %v1381_v23, %v971_v24 }
 0x3be   :  { %v976_v27 = vmax.f32 %v972_v25, 0.0 }
 0x3c0   :  { %978 = vst [vmem:[#allocation11] sm:$0xff] %v976_v27 }
 0x3c3   :  { %v973_v28 = vpop.f32.mrf.mxu0 }
 0x3c4   :  { %v974_v29 = vadd.f32 %v1381_v23, %v973_v28 }
 0x3c6   :  { %v977_v31 = vmax.f32 %v974_v29, 0.0 }
 0x3c8   :  { %979 = vst [vmem:[#allocation11 + $0x8] sm:$0xff] %v977_v31 }
 0x3c9   :  { %992 = dma.vmem_to_hbm [thread:$0]  %s985_s17, 256, %s987_s16, [#allocation4], %s1569_s24, %s1569_s24, %s1570_s25  }
 0x3ca   :  { %1560 = dma.done.wait [#allocation4], 256  }
 0x3cb   :  { %1561 = vsyncadd [#allocation4], 4294967040 }
 0x3cc   :  { %1562 = dma.done.wait [#allocation13], 384  }
 0x3cd   :  { %1563 = vsyncadd [#allocation13], 4294966912 }
 0x3ce   :  { %1014 = vsyncpa [#allocation3], 1 }
 0x3cf   :  { %1015 = vsyncpa [#allocation6], 1 }
 0x3d0   :  { %1016 = vsyncpa [#allocation9], 1 }
 0x3d1   :  { %1017 = vsyncpa [#allocation4], 1 }
 0x3d2   :  { %1018 = vsyncpa [#allocation13], 1 }

</bundles_post_ra>
